<compile_context>
chip_gen: v7x
topology: tpu7x:2x2x1
jax: 0.10.0
libtpu: 0.0.40
codegen_flags: <defaults>
</compile_context>

<pallas_src>
import jax
import jax.numpy as jnp
from jax.experimental import pallas as pl
from jax.experimental.pallas import tpu as pltpu

EPS = 1e-6


# --------------------------------------------------------------------------- #
# Kernel: tiled matmul with K-reduction accumulator.
# --------------------------------------------------------------------------- #
def bitlinear_kernel(x_ref, w_ref, o_ref, acc_ref):
    # x_ref: (TM, TK) narrow-dtype quantized activations (already sign(x))
    # w_ref: (TK, TN) narrow-dtype ternary weights (already W_q^T)
    # o_ref: (TM, TN) f32 output tile
    # acc_ref: (TM, TN) int32 (int8 path) or f32 (bf16 path) accumulator
    k = pl.program_id(2)

    @pl.when(k == 0)
    def _init():
        acc_ref[...] = jnp.zeros_like(acc_ref)

    acc_ref[...] += jnp.dot(
        x_ref[...], w_ref[...], preferred_element_type=acc_ref.dtype
    )

    @pl.when(k == pl.num_programs(2) - 1)
    def _store():
        o_ref[...] = acc_ref[...].astype(o_ref.dtype)


# --------------------------------------------------------------------------- #
# Helpers
# --------------------------------------------------------------------------- #
def _round_up(a, b):
    return (a + b - 1) // b * b


def _pick_tile(dim, tile_max, granule):
    """Tile size: multiple of `granule`, <= tile_max, minimizing padding."""
    d = _round_up(max(dim, 1), granule)
    num = -(-d // tile_max)
    tile = _round_up(-(-d // num), granule)
    return tile, tile * num  # (tile, padded_dim)


def hw_config(force_bf16=False):
    """Pick operand/accumulator dtypes and tiling/VMEM defaults per TPU gen."""
    try:
        kind = jax.devices()[0].device_kind.lower()
    except Exception:
        kind = ""
    is_v7 = "7" in kind
    has_int_mxu = (not is_v7) and any(g in kind for g in ("v4", "v5", "v6"))

    if has_int_mxu and not force_bf16:
        # v4/v5e/v6e: int8 MXU mode ~2x bf16 rate, half the DMA/VMEM bytes.
        operand_dtype, acc_dtype = jnp.int8, jnp.int32
    else:
        # v7x / unknown: bf16 operands, f32 accumulation (exact for +/-1 sums).
        # fp8-e4m3 would represent {-1,0,+1} exactly and run ~2x faster on
        # v7x's MXU, but bf16 is the guaranteed-to-lower path.
        operand_dtype, acc_dtype = jnp.bfloat16, jnp.float32

    if is_v7 or not kind:
        vmem_limit = 48 * 1024 * 1024   # v7x has 64 MiB physical VMEM
        tm_max = 256
    else:
        vmem_limit = 100 * 1024 * 1024  # v5e/v6e have 128 MiB VMEM
        tm_max = 512                    # halves the number of full-weight passes

    return dict(
        operand_dtype=operand_dtype,
        acc_dtype=acc_dtype,
        vmem_limit_bytes=vmem_limit,
        tm_max=tm_max,
    )


# --------------------------------------------------------------------------- #
# One-shot weight preparation (call once per weight value, NOT per forward).
# --------------------------------------------------------------------------- #
def prepare_weight(weight, hw, *, tn_max=512, tk_max=2048):
    """Ternarize, transpose to (K, N), pad to tile boundaries, narrow-cast."""
    N, K = weight.shape
    w32 = weight.astype(jnp.float32)
    # gamma over the FULL unpadded weight -> identical to the reference
    # regardless of any tiling/padding done afterwards.
    gamma = jnp.mean(jnp.abs(w32)) + EPS
    ws = w32 / gamma
    w_q = jnp.sign(ws) * jnp.minimum(jnp.round(jnp.abs(ws)), 1.0)  # {-1,0,+1}

    tn, Np = _pick_tile(N, tn_max, 128)   # lane-dense output tiles
    tk, Kp = _pick_tile(K, tk_max, 128)   # >=1 MiB weight DMA per K step

    w_kn = jnp.pad(w_q.T, ((0, Kp - K), (0, Np - N))).astype(hw["operand_dtype"])

    cfg = dict(
        N=N, K=K, Np=Np, Kp=Kp, tn=tn, tk=tk,
        operand_dtype=hw["operand_dtype"], acc_dtype=hw["acc_dtype"],
        vmem_limit_bytes=hw["vmem_limit_bytes"], tm_max=hw["tm_max"],
    )
    return w_kn, cfg


# --------------------------------------------------------------------------- #
# Forward
# --------------------------------------------------------------------------- #
def bitlinear15b(x, w_prepped, cfg):
    """x: (..., in_features); w_prepped: (Kp, Np) from prepare_weight()."""
    orig_shape = x.shape
    K, N = cfg["K"], cfg["N"]
    Kp, Np, tn, tk = cfg["Kp"], cfg["Np"], cfg["tn"], cfg["tk"]
    op_dtype, acc_dtype = cfg["operand_dtype"], cfg["acc_dtype"]

    x2d = x.reshape(-1, K)
    M = x2d.shape[0]

    # Activation quantization hoisted out of the kernel: narrow-dtype sign(x).
    x_q = jnp.sign(x2d).astype(op_dtype)

    # Row tile: multiple of 32 (satisfies both (8,128) f32 and (32,128) int8).
    tm, Mp = _pick_tile(M, cfg["tm_max"], 32)
    x_p = jnp.pad(x_q, ((0, Mp - M), (0, Kp - K)))

    grid_m, grid_n, grid_k = Mp // tm, Np // tn, Kp // tk

    # Shape-aware loop order (only matters when K is a single resident tile):
    # keep the operand with more HBM bytes resident, re-stream the smaller one.
    x_bytes = Mp * Kp * jnp.dtype(op_dtype).itemsize
    w_bytes = Kp * Np * jnp.dtype(op_dtype).itemsize
    n_inner_cost = x_bytes + grid_m * w_bytes   # grid (m, n): weight re-read per m tile
    m_inner_cost = w_bytes + grid_n * x_bytes   # grid (n, m): x re-read per n tile

    if grid_k == 1 and m_inner_cost < n_inner_cost:
        grid = (grid_n, grid_m, grid_k)
        x_spec = pl.BlockSpec((tm, tk), lambda j, i, k: (i, k))
        w_spec = pl.BlockSpec((tk, tn), lambda j, i, k: (k, j))
        o_spec = pl.BlockSpec((tm, tn), lambda j, i, k: (i, j))
    else:
        grid = (grid_m, grid_n, grid_k)
        x_spec = pl.BlockSpec((tm, tk), lambda i, j, k: (i, k))
        w_spec = pl.BlockSpec((tk, tn), lambda i, j, k: (k, j))
        o_spec = pl.BlockSpec((tm, tn), lambda i, j, k: (i, j))

    out = pl.pallas_call(
        bitlinear_kernel,
        out_shape=jax.ShapeDtypeStruct((Mp, Np), jnp.float32),
        grid_spec=pltpu.PrefetchScalarGridSpec(
            num_scalar_prefetch=0,
            grid=grid,
            in_specs=[x_spec, w_spec],
            out_specs=o_spec,
            scratch_shapes=[pltpu.VMEM((tm, tn), acc_dtype)],
        ),
        compiler_params=pltpu.CompilerParams(
            dimension_semantics=("parallel", "parallel", "arbitrary"),
            vmem_limit_bytes=cfg["vmem_limit_bytes"],
        ),
    )(x_p, w_p := w_prepped)

    return out[:M, :N].reshape(orig_shape[:-1] + (N,))


# --------------------------------------------------------------------------- #
# Pure-JAX reference (matches the PyTorch module)
# --------------------------------------------------------------------------- #
def reference(x, weight):
    gamma = jnp.mean(jnp.abs(weight)) + EPS
    ws = weight / gamma
    wq = jnp.sign(ws) * jnp.minimum(jnp.round(jnp.abs(ws)), 1.0)
    return jnp.sign(x) @ wq.T


if __name__ == "__main__":
    key = jax.random.PRNGKey(0)
    kx, kw = jax.random.split(key)

    batch, seq, in_features, out_features = 2, 8, 32, 64

    # deterministic "randn"-style init (as in nn.Parameter(torch.randn(...)))
    weight = jax.random.normal(kw, (out_features, in_features), dtype=jnp.float32)
    x = jax.random.normal(kx, (batch, seq, in_features), dtype=jnp.float32)

    def run(force_bf16=False):
        hw = hw_config(force_bf16=force_bf16)
        # Weight prep is one-shot; in a model this is cached per weight update.
        w_p, cfg = prepare_weight(weight, hw)
        return bitlinear15b(x, w_p, cfg)

    try:
        y = jax.block_until_ready(run())
    except Exception:
        # Narrow-dtype MXU path unavailable on this backend -> bf16/f32 fallback.
        y = jax.block_until_ready(run(force_bf16=True))

    y_ref = reference(x, weight)
    assert y.shape == (batch, seq, out_features)
    assert jnp.allclose(y, y_ref, atol=1e-5, rtol=1e-5), "mismatch vs reference"

    print("KERNEL_OK")
</pallas_src>

<mosaic_0001>
module attributes {stable_mosaic.version = 11 : i64} {
  func.func @bitlinear_kernel(%arg0: i32, %arg1: i32, %arg2: i32, %arg3: memref<32x128xbf16, #tpu.memory_space<vmem>>, %arg4: memref<128x128xbf16, #tpu.memory_space<vmem>>, %arg5: memref<32x128xf32, #tpu.memory_space<vmem>>, %arg6: memref<32x128xf32, #tpu.memory_space<vmem>>) attributes {dimension_semantics = [#tpu.dimension_semantics<parallel>, #tpu.dimension_semantics<parallel>, #tpu.dimension_semantics<arbitrary>], iteration_bounds = array<i64: 1, 1, 1>, scalar_prefetch = 0 : i64, scratch_operands = 1 : i64, tpu.core_type = #tpu.core_type<tc>, window_params = [{transform_indices = @transform_0, window_bounds = array<i64: 32, 128>}, {transform_indices = @transform_1, window_bounds = array<i64: 128, 128>}, {transform_indices = @transform_2, window_bounds = array<i64: 32, 128>}]} {
    %c0_i32 = arith.constant 0 : i32
    %0 = arith.cmpi eq, %arg2, %c0_i32 : i32
    %1 = arith.extui %0 : i1 to i32
    %c0_i32_0 = arith.constant 0 : i32
    %2 = arith.cmpi ne, %1, %c0_i32_0 : i32
    scf.if %2 {
      %cst_10 = arith.constant 0.000000e+00 : f32
      %12 = vector.broadcast %cst_10 : f32 to vector<32x128xf32>
      %c0_11 = arith.constant 0 : index
      %c0_12 = arith.constant 0 : index
      %13 = vector.load %arg6[%c0_11, %c0_12] : memref<32x128xf32, #tpu.memory_space<vmem>>, vector<32x128xf32>
      tpu.vector_store %arg6[%c0_11, %c0_12], %12 {strides = array<i32>} : memref<32x128xf32, #tpu.memory_space<vmem>>, vector<32x128xf32>,
    } else {
    }
    %c0 = arith.constant 0 : index
    %c0_1 = arith.constant 0 : index
    %3 = vector.load %arg6[%c0, %c0_1] : memref<32x128xf32, #tpu.memory_space<vmem>>, vector<32x128xf32>
    %c0_2 = arith.constant 0 : index
    %c0_3 = arith.constant 0 : index
    %4 = vector.load %arg3[%c0_2, %c0_3] : memref<32x128xbf16, #tpu.memory_space<vmem>>, vector<32x128xbf16>
    %c0_4 = arith.constant 0 : index
    %c0_5 = arith.constant 0 : index
    %5 = vector.load %arg4[%c0_4, %c0_5] : memref<128x128xbf16, #tpu.memory_space<vmem>>, vector<128x128xbf16>
    %cst = arith.constant dense<0.000000e+00> : vector<32x128xf32>
    %6 = tpu.matmul %4, %5, %cst {dimension_numbers = #tpu.dot_dimension_numbers<[1], [0], [0], [1], [0, 0, 1, 1], [], []>} : vector<32x128xbf16>, vector<128x128xbf16>, vector<32x128xf32> -> vector<32x128xf32>
    %7 = arith.addf %3, %6 : vector<32x128xf32>
    %c0_6 = arith.constant 0 : index
    %c0_7 = arith.constant 0 : index
    %8 = vector.load %arg6[%c0_6, %c0_7] : memref<32x128xf32, #tpu.memory_space<vmem>>, vector<32x128xf32>
    tpu.vector_store %arg6[%c0_6, %c0_7], %7 {strides = array<i32>} : memref<32x128xf32, #tpu.memory_space<vmem>>, vector<32x128xf32>,
    %c0_i32_8 = arith.constant 0 : i32
    %9 = arith.cmpi eq, %arg2, %c0_i32_8 : i32
    %10 = arith.extui %9 : i1 to i32
    %c0_i32_9 = arith.constant 0 : i32
    %11 = arith.cmpi ne, %10, %c0_i32_9 : i32
    scf.if %11 {
      %c0_10 = arith.constant 0 : index
      %c0_11 = arith.constant 0 : index
      %12 = vector.load %arg6[%c0_10, %c0_11] : memref<32x128xf32, #tpu.memory_space<vmem>>, vector<32x128xf32>
      %c0_12 = arith.constant 0 : index
      %c0_13 = arith.constant 0 : index
      %13 = vector.load %arg5[%c0_12, %c0_13] : memref<32x128xf32, #tpu.memory_space<vmem>>, vector<32x128xf32>
      tpu.vector_store %arg5[%c0_12, %c0_13], %12 {strides = array<i32>} : memref<32x128xf32, #tpu.memory_space<vmem>>, vector<32x128xf32>,
    } else {
    }
    return
  }
  func.func @transform_0(%arg0: i32, %arg1: i32, %arg2: i32) -> (i32, i32) {
    %c0_i32 = arith.constant 0 : i32
    return %arg0, %arg2 : i32, i32
  }
  func.func @transform_1(%arg0: i32, %arg1: i32, %arg2: i32) -> (i32, i32) {
    %c0_i32 = arith.constant 0 : i32
    return %arg2, %arg1 : i32, i32
  }
  func.func @transform_2(%arg0: i32, %arg1: i32, %arg2: i32) -> (i32, i32) {
    %c0_i32 = arith.constant 0 : i32
    return %arg0, %arg1 : i32, i32
  }
}

module attributes {stable_mosaic.version = 11 : i64} {
  func.func @bitlinear_kernel(%arg0: i32, %arg1: i32, %arg2: i32, %arg3: memref<32x128xbf16, #tpu.memory_space<vmem>>, %arg4: memref<128x128xbf16, #tpu.memory_space<vmem>>, %arg5: memref<32x128xf32, #tpu.memory_space<vmem>>, %arg6: memref<32x128xf32, #tpu.memory_space<vmem>>) attributes {dimension_semantics = [#tpu.dimension_semantics<parallel>, #tpu.dimension_semantics<parallel>, #tpu.dimension_semantics<arbitrary>], iteration_bounds = array<i64: 1, 1, 1>, scalar_prefetch = 0 : i64, scratch_operands = 1 : i64, tpu.core_type = #tpu.core_type<tc>, window_params = [{transform_indices = @transform_0, window_bounds = array<i64: 32, 128>}, {transform_indices = @transform_1, window_bounds = array<i64: 128, 128>}, {transform_indices = @transform_2, window_bounds = array<i64: 32, 128>}]} {
    %c0_i32 = arith.constant 0 : i32
    %0 = arith.cmpi eq, %arg2, %c0_i32 : i32
    %1 = arith.extui %0 : i1 to i32
    %c0_i32_0 = arith.constant 0 : i32
    %2 = arith.cmpi ne, %1, %c0_i32_0 : i32
    scf.if %2 {
      %cst_10 = arith.constant 0.000000e+00 : f32
      %12 = vector.broadcast %cst_10 : f32 to vector<32x128xf32>
      %c0_11 = arith.constant 0 : index
      %c0_12 = arith.constant 0 : index
      %13 = vector.load %arg6[%c0_11, %c0_12] : memref<32x128xf32, #tpu.memory_space<vmem>>, vector<32x128xf32>
      tpu.vector_store %arg6[%c0_11, %c0_12], %12 {strides = array<i32>} : memref<32x128xf32, #tpu.memory_space<vmem>>, vector<32x128xf32>,
    } else {
    }
    %c0 = arith.constant 0 : index
    %c0_1 = arith.constant 0 : index
    %3 = vector.load %arg6[%c0, %c0_1] : memref<32x128xf32, #tpu.memory_space<vmem>>, vector<32x128xf32>
    %c0_2 = arith.constant 0 : index
    %c0_3 = arith.constant 0 : index
    %4 = vector.load %arg3[%c0_2, %c0_3] : memref<32x128xbf16, #tpu.memory_space<vmem>>, vector<32x128xbf16>
    %c0_4 = arith.constant 0 : index
    %c0_5 = arith.constant 0 : index
    %5 = vector.load %arg4[%c0_4, %c0_5] : memref<128x128xbf16, #tpu.memory_space<vmem>>, vector<128x128xbf16>
    %cst = arith.constant dense<0.000000e+00> : vector<32x128xf32>
    %6 = tpu.matmul %4, %5, %cst {dimension_numbers = #tpu.dot_dimension_numbers<[1], [0], [0], [1], [0, 0, 1, 1], [], []>} : vector<32x128xbf16>, vector<128x128xbf16>, vector<32x128xf32> -> vector<32x128xf32>
    %7 = arith.addf %3, %6 : vector<32x128xf32>
    %c0_6 = arith.constant 0 : index
    %c0_7 = arith.constant 0 : index
    %8 = vector.load %arg6[%c0_6, %c0_7] : memref<32x128xf32, #tpu.memory_space<vmem>>, vector<32x128xf32>
    tpu.vector_store %arg6[%c0_6, %c0_7], %7 {strides = array<i32>} : memref<32x128xf32, #tpu.memory_space<vmem>>, vector<32x128xf32>,
    %c0_i32_8 = arith.constant 0 : i32
    %9 = arith.cmpi eq, %arg2, %c0_i32_8 : i32
    %10 = arith.extui %9 : i1 to i32
    %c0_i32_9 = arith.constant 0 : i32
    %11 = arith.cmpi ne, %10, %c0_i32_9 : i32
    scf.if %11 {
      %c0_10 = arith.constant 0 : index
      %c0_11 = arith.constant 0 : index
      %12 = vector.load %arg6[%c0_10, %c0_11] : memref<32x128xf32, #tpu.memory_space<vmem>>, vector<32x128xf32>
      %c0_12 = arith.constant 0 : index
      %c0_13 = arith.constant 0 : index
      %13 = vector.load %arg5[%c0_12, %c0_13] : memref<32x128xf32, #tpu.memory_space<vmem>>, vector<32x128xf32>
      tpu.vector_store %arg5[%c0_12, %c0_13], %12 {strides = array<i32>} : memref<32x128xf32, #tpu.memory_space<vmem>>, vector<32x128xf32>,
    } else {
    }
    return
  }
  func.func @transform_0(%arg0: i32, %arg1: i32, %arg2: i32) -> (i32, i32) {
    %c0_i32 = arith.constant 0 : i32
    return %arg0, %arg2 : i32, i32
  }
  func.func @transform_1(%arg0: i32, %arg1: i32, %arg2: i32) -> (i32, i32) {
    %c0_i32 = arith.constant 0 : i32
    return %arg2, %arg1 : i32, i32
  }
  func.func @transform_2(%arg0: i32, %arg1: i32, %arg2: i32) -> (i32, i32) {
    %c0_i32 = arith.constant 0 : i32
    return %arg0, %arg1 : i32, i32
  }
}

</mosaic_0001>

<bundles_post_ra>
// kernel: tpu_custom_call.1
= control target key start
LH: loop header
LB: loop body
LE: loop exit
PB: predicated region body
PF: predicated region fallthrough
CT: control target
= control target key end

     0   :  { %7 = vsyncpa [#allocation4], 0  ;;  %s406_s0 = inlined_call_operand.hbm [shape: bf16[32,128], index: 0, kind: input, shape index: {}]   ;;  %s407_s1 = inlined_call_operand.hbm [shape: bf16[128,128], index: 1, kind: input, shape index: {}]   ;;  %s408_s2 = inlined_call_operand.hbm [shape: f32[32,128], index: 2, kind: output, shape index: {}]  }
   0x1   :  { %8 = vsyncpa [#allocation7], 0 }
   0x2   :  { %9 = vsyncpa [#allocation5], 0  ;;  %s348_s9 = smov [#allocation3]   ;;  %s276_s13 = scalar_lea.hbm %s406_s0, 256 }
   0x3   :  { %s15_s10 = sshll.u32 %s348_s9, 4  ;;  %p277_p0 = scmp.ne.s32.totalorder %s406_s0, %s276_s13  ;;  %s16_s10 = int_to_ptr.vmem [resolvable:$true] %s15_s10 }
   0x4   :  { %p280_p1 = scmp.lt.u32.totalorder %s276_s13, %s406_s0 }
   0x6   :  { %p282_p2 = pnand %p280_p1, %p277_p0 }
   0x8   :  { %285 = shalt.err (!%p282_p2)
}
   0x9   :  { %s286_s18 = scalar_lea.vmem %s16_s10, 256  ;;  %p291_p4 = scmp.lt.s32.totalorder %s16_s10, %s16_s10 }
   0xa   :  { %p287_p3 = scmp.ne.s32.totalorder %s16_s10, %s286_s18  ;;  %p292_p5 = scmp.lt.s32.totalorder %s286_s18, %s286_s18 }
   0xc   :  { %p293_p6 = por %p292_p5, %p291_p4 }
   0xe   :  { %p294_p7 = pnand %p293_p6, %p287_p3 }
  0x10   :  { %297 = shalt.err (!%p294_p7)
}
  0x11   :  { %s349_s19 = smov 64   ;;  %s350_s20 = smov 4  }
  0x12   :  { %21 = dma.hbm_to_vmem [thread:$0]  %s406_s0, 256, %s16_s10, [#allocation4], %s349_s19, %s349_s19, %s350_s20  }
  0x13   :  { %s351_s23 = smov [#allocation6]   ;;  %s298_s27 = scalar_lea.hbm %s407_s1, 1024 }
  0x14   :  { %s27_s24 = sshll.u32 %s351_s23, 4  ;;  %p299_p8 = scmp.ne.s32.totalorder %s407_s1, %s298_s27  ;;  %s28_s24 = int_to_ptr.vmem [resolvable:$true] %s27_s24 }
  0x15   :  { %p302_p9 = scmp.lt.u32.totalorder %s298_s27, %s407_s1 }
  0x17   :  { %p304_p10 = pnand %p302_p9, %p299_p8 }
  0x19   :  { %307 = shalt.err (!%p304_p10)
}
  0x1a   :  { %s308_s4 = scalar_lea.vmem %s28_s24, 1024  ;;  %p313_p12 = scmp.lt.s32.totalorder %s28_s24, %s28_s24 }
  0x1b   :  { %p309_p11 = scmp.ne.s32.totalorder %s28_s24, %s308_s4  ;;  %p314_p13 = scmp.lt.s32.totalorder %s308_s4, %s308_s4 }
  0x1d   :  { %p315_p0 = por %p314_p13, %p313_p12 }
  0x1f   :  { %p316_p1 = pnand %p315_p0, %p309_p11 }
  0x21   :  { %319 = shalt.err (!%p316_p1)
}
  0x22   :  { %33 = dma.hbm_to_vmem [thread:$0]  %s407_s1, 1024, %s28_s24, [#allocation7], %s349_s19, %s349_s19, %s350_s20  }
  0x23   :  { %342 = dma.done.wait [#allocation4], 256  }
  0x24   :  { %343 = vsyncadd [#allocation4], 4294967040 }
  0x25   :  { %344 = dma.done.wait [#allocation7], 1024  }
  0x26   :  { %345 = vsyncadd [#allocation7], 4294966272  ;;  %v266_v0 = vld [vmem:[#allocation6] sm:$0xff]   ;;  %v267_v1 = vld [vmem:[#allocation6 + $0x8] sm:$0xff]   ;;  %s352_s1 = smov [#allocation8]  }
  0x27   :  { %239 = vmatprep.subr.bf16.mxu0 %v266_v0  ;;  %v268_v2 = vld [vmem:[#allocation6 + $0x10] sm:$0xff]   ;;  %v269_v3 = vld [vmem:[#allocation6 + $0x18] sm:$0xff]   ;;  %v270_v5 = vld [vmem:[#allocation6 + $0x20] sm:$0xff]   ;;  %s206_s6 = sshll.u32 %s352_s1, 4  ;;  %s207_s6 = int_to_ptr.vmem [resolvable:$true] %s206_s6 }
  0x28   :  { %240 = vmatpush3.bf16.msra.mxu0 %v266_v0  ;;  %v274_v4 = vld [vmem:[#allocation3] sm:$0xff]   ;;  %v271_v6 = vld [vmem:[#allocation6 + $0x28] sm:$0xff]   ;;  %v273_v8 = vld [vmem:[#allocation6 + $0x38] sm:$0xff]   ;;  %s320_s7 = scalar_lea.vmem %s207_s6, 512  ;;  %p325_p3 = scmp.lt.s32.totalorder %s207_s6, %s207_s6 }
  0x29   :  { %241 = vmatprep.subr.bf16.mxu0 %v267_v1  ;;  %255 = vmatprep.mubr.bf16.mxu0 %v274_v4  ;;  %v272_v7 = vld [vmem:[#allocation6 + $0x30] sm:$0xff]   ;;  %v275_v9 = vld [vmem:[#allocation3 + $0x8] sm:$0xff]   ;;  %p321_p2 = scmp.ne.s32.totalorder %s207_s6, %s320_s7  ;;  %p326_p4 = scmp.lt.s32.totalorder %s320_s7, %s320_s7 }
  0x2b   :  { %p327_p5 = por %p326_p4, %p325_p3 }
  0x2c   :  { %242 = vmatpush3.bf16.msra.mxu0 %v267_v1 }
  0x2d   :  { %243 = vmatprep.subr.bf16.mxu0 %v268_v2  ;;  %p328_p6 = pnand %p327_p5, %p321_p2 }
  0x30   :  { %244 = vmatpush3.bf16.msra.mxu0 %v268_v2 }
  0x31   :  { %245 = vmatprep.subr.bf16.mxu0 %v269_v3 }
  0x34   :  { %246 = vmatpush3.bf16.msra.mxu0 %v269_v3 }
  0x35   :  { %247 = vmatprep.subr.bf16.mxu0 %v270_v5 }
  0x38   :  { %248 = vmatpush3.bf16.msra.mxu0 %v270_v5 }
  0x39   :  { %249 = vmatprep.subr.bf16.mxu0 %v271_v6 }
  0x3c   :  { %250 = vmatpush3.bf16.msra.mxu0 %v271_v6 }
  0x3d   :  { %251 = vmatprep.subr.bf16.mxu0 %v272_v7 }
  0x40   :  { %252 = vmatpush3.bf16.msra.mxu0 %v272_v7 }
  0x41   :  { %253 = vmatprep.subr.bf16.mxu0 %v273_v8 }
  0x44   :  { %254 = vmatpush3.bf16.msra.mxu0 %v273_v8 }
  0x47   :  { %256 = vmatmul.mubr.bf16.vlgmr.msra.gmra.mrb[0].mxu0 %v275_v9 }
 0x11a   :  { %v257_v10 = vpop.f32.mrb[0].mxu0 }
 0x11b   :  { %199 = vst [vmem:[#allocation8 + $0x10] sm:$0xff] %v257_v10  ;;  %v167_v11 = vpop.f32.mrb[1].mxu0 }
 0x11c   :  { %197 = vst [vmem:[#allocation8] sm:$0xff] %v167_v11  ;;  %v258_v12 = vpop.f32.mrb[2].mxu0 }
 0x11d   :  { %200 = vst [vmem:[#allocation8 + $0x18] sm:$0xff] %v258_v12  ;;  %v170_v13 = vpop.f32.mrb[3].mxu0 }
 0x11e   :  { %198 = vst [vmem:[#allocation8 + $0x8] sm:$0xff] %v170_v13 }
 0x11f   :  { %331 = shalt.err (!%p328_p6)
}
 0x120   :  { %s332_s10 = scalar_lea.hbm %s408_s2, 512 }
 0x121   :  { %p333_p7 = scmp.ne.s32.totalorder %s408_s2, %s332_s10  ;;  %p336_p8 = scmp.lt.u32.totalorder %s332_s10, %s408_s2 }
 0x123   :  { %p338_p9 = pnand %p336_p8, %p333_p7 }
 0x125   :  { %341 = shalt.err (!%p338_p9)
}
 0x126   :  { %s353_s15 = smov 128   ;;  %s354_s16 = smov 8  }
 0x127   :  { %212 = dma.vmem_to_hbm [thread:$0]  %s207_s6, 512, %s408_s2, [#allocation5], %s353_s15, %s353_s15, %s354_s16  }
 0x128   :  { %346 = dma.done.wait [#allocation5], 512  }
 0x129   :  { %347 = vsyncadd [#allocation5], 4294966784 }
 0x12a   :  { %216 = vsyncpa [#allocation4], 1 }
 0x12b   :  { %217 = vsyncpa [#allocation7], 1 }
 0x12c   :  { %218 = vsyncpa [#allocation5], 1 }

// kernel: tpu_custom_call.1
= control target key start
LH: loop header
LB: loop body
LE: loop exit
PB: predicated region body
PF: predicated region fallthrough
CT: control target
= control target key end

     0   :  { %7 = vsyncpa [#allocation4], 0  ;;  %s406_s0 = inlined_call_operand.hbm [shape: bf16[32,128], index: 0, kind: input, shape index: {}]   ;;  %s407_s1 = inlined_call_operand.hbm [shape: bf16[128,128], index: 1, kind: input, shape index: {}]   ;;  %s408_s2 = inlined_call_operand.hbm [shape: f32[32,128], index: 2, kind: output, shape index: {}]  }
   0x1   :  { %8 = vsyncpa [#allocation7], 0 }
   0x2   :  { %9 = vsyncpa [#allocation5], 0  ;;  %s348_s9 = smov [#allocation3]   ;;  %s276_s13 = scalar_lea.hbm %s406_s0, 256 }
   0x3   :  { %s15_s10 = sshll.u32 %s348_s9, 4  ;;  %p277_p0 = scmp.ne.s32.totalorder %s406_s0, %s276_s13  ;;  %s16_s10 = int_to_ptr.vmem [resolvable:$true] %s15_s10 }
   0x4   :  { %p280_p1 = scmp.lt.u32.totalorder %s276_s13, %s406_s0 }
   0x6   :  { %p282_p2 = pnand %p280_p1, %p277_p0 }
   0x8   :  { %285 = shalt.err (!%p282_p2)
}
   0x9   :  { %s286_s18 = scalar_lea.vmem %s16_s10, 256  ;;  %p291_p4 = scmp.lt.s32.totalorder %s16_s10, %s16_s10 }
   0xa   :  { %p287_p3 = scmp.ne.s32.totalorder %s16_s10, %s286_s18  ;;  %p292_p5 = scmp.lt.s32.totalorder %s286_s18, %s286_s18 }
   0xc   :  { %p293_p6 = por %p292_p5, %p291_p4 }
   0xe   :  { %p294_p7 = pnand %p293_p6, %p287_p3 }
  0x10   :  { %297 = shalt.err (!%p294_p7)
}
  0x11   :  { %s349_s19 = smov 64   ;;  %s350_s20 = smov 4  }
  0x12   :  { %21 = dma.hbm_to_vmem [thread:$0]  %s406_s0, 256, %s16_s10, [#allocation4], %s349_s19, %s349_s19, %s350_s20  }
  0x13   :  { %s351_s23 = smov [#allocation6]   ;;  %s298_s27 = scalar_lea.hbm %s407_s1, 1024 }
  0x14   :  { %s27_s24 = sshll.u32 %s351_s23, 4  ;;  %p299_p8 = scmp.ne.s32.totalorder %s407_s1, %s298_s27  ;;  %s28_s24 = int_to_ptr.vmem [resolvable:$true] %s27_s24 }
  0x15   :  { %p302_p9 = scmp.lt.u32.totalorder %s298_s27, %s407_s1 }
  0x17   :  { %p304_p10 = pnand %p302_p9, %p299_p8 }
  0x19   :  { %307 = shalt.err (!%p304_p10)
}
  0x1a   :  { %s308_s4 = scalar_lea.vmem %s28_s24, 1024  ;;  %p313_p12 = scmp.lt.s32.totalorder %s28_s24, %s28_s24 }
  0x1b   :  { %p309_p11 = scmp.ne.s32.totalorder %s28_s24, %s308_s4  ;;  %p314_p13 = scmp.lt.s32.totalorder %s308_s4, %s308_s4 }
  0x1d   :  { %p315_p0 = por %p314_p13, %p313_p12 }
  0x1f   :  { %p316_p1 = pnand %p315_p0, %p309_p11 }
  0x21   :  { %319 = shalt.err (!%p316_p1)
}
  0x22   :  { %33 = dma.hbm_to_vmem [thread:$0]  %s407_s1, 1024, %s28_s24, [#allocation7], %s349_s19, %s349_s19, %s350_s20  }
  0x23   :  { %342 = dma.done.wait [#allocation4], 256  }
  0x24   :  { %343 = vsyncadd [#allocation4], 4294967040 }
  0x25   :  { %344 = dma.done.wait [#allocation7], 1024  }
  0x26   :  { %345 = vsyncadd [#allocation7], 4294966272  ;;  %v266_v0 = vld [vmem:[#allocation6] sm:$0xff]   ;;  %v267_v1 = vld [vmem:[#allocation6 + $0x8] sm:$0xff]   ;;  %s352_s1 = smov [#allocation8]  }
  0x27   :  { %239 = vmatprep.subr.bf16.mxu0 %v266_v0  ;;  %v268_v2 = vld [vmem:[#allocation6 + $0x10] sm:$0xff]   ;;  %v269_v3 = vld [vmem:[#allocation6 + $0x18] sm:$0xff]   ;;  %v270_v5 = vld [vmem:[#allocation6 + $0x20] sm:$0xff]   ;;  %s206_s6 = sshll.u32 %s352_s1, 4  ;;  %s207_s6 = int_to_ptr.vmem [resolvable:$true] %s206_s6 }
  0x28   :  { %240 = vmatpush3.bf16.msra.mxu0 %v266_v0  ;;  %v274_v4 = vld [vmem:[#allocation3] sm:$0xff]   ;;  %v271_v6 = vld [vmem:[#allocation6 + $0x28] sm:$0xff]   ;;  %v273_v8 = vld [vmem:[#allocation6 + $0x38] sm:$0xff]   ;;  %s320_s7 = scalar_lea.vmem %s207_s6, 512  ;;  %p325_p3 = scmp.lt.s32.totalorder %s207_s6, %s207_s6 }
  0x29   :  { %241 = vmatprep.subr.bf16.mxu0 %v267_v1  ;;  %255 = vmatprep.mubr.bf16.mxu0 %v274_v4  ;;  %v272_v7 = vld [vmem:[#allocation6 + $0x30] sm:$0xff]   ;;  %v275_v9 = vld [vmem:[#allocation3 + $0x8] sm:$0xff]   ;;  %p321_p2 = scmp.ne.s32.totalorder %s207_s6, %s320_s7  ;;  %p326_p4 = scmp.lt.s32.totalorder %s320_s7, %s320_s7 }
  0x2b   :  { %p327_p5 = por %p326_p4, %p325_p3 }
  0x2c   :  { %242 = vmatpush3.bf16.msra.mxu0 %v267_v1 }
  0x2d   :  { %243 = vmatprep.subr.bf16.mxu0 %v268_v2  ;;  %p328_p6 = pnand %p327_p5, %p321_p2 }
  0x30   :  { %244 = vmatpush3.bf16.msra.mxu0 %v268_v2 }
  0x31   :  { %245 = vmatprep.subr.bf16.mxu0 %v269_v3 }
  0x34   :  { %246 = vmatpush3.bf16.msra.mxu0 %v269_v3 }
  0x35   :  { %247 = vmatprep.subr.bf16.mxu0 %v270_v5 }
  0x38   :  { %248 = vmatpush3.bf16.msra.mxu0 %v270_v5 }
  0x39   :  { %249 = vmatprep.subr.bf16.mxu0 %v271_v6 }
  0x3c   :  { %250 = vmatpush3.bf16.msra.mxu0 %v271_v6 }
  0x3d   :  { %251 = vmatprep.subr.bf16.mxu0 %v272_v7 }
  0x40   :  { %252 = vmatpush3.bf16.msra.mxu0 %v272_v7 }
  0x41   :  { %253 = vmatprep.subr.bf16.mxu0 %v273_v8 }
  0x44   :  { %254 = vmatpush3.bf16.msra.mxu0 %v273_v8 }
  0x47   :  { %256 = vmatmul.mubr.bf16.vlgmr.msra.gmra.mrb[0].mxu0 %v275_v9 }
 0x11a   :  { %v257_v10 = vpop.f32.mrb[0].mxu0 }
 0x11b   :  { %199 = vst [vmem:[#allocation8 + $0x10] sm:$0xff] %v257_v10  ;;  %v167_v11 = vpop.f32.mrb[1].mxu0 }
 0x11c   :  { %197 = vst [vmem:[#allocation8] sm:$0xff] %v167_v11  ;;  %v258_v12 = vpop.f32.mrb[2].mxu0 }
 0x11d   :  { %200 = vst [vmem:[#allocation8 + $0x18] sm:$0xff] %v258_v12  ;;  %v170_v13 = vpop.f32.mrb[3].mxu0 }
 0x11e   :  { %198 = vst [vmem:[#allocation8 + $0x8] sm:$0xff] %v170_v13 }
 0x11f   :  { %331 = shalt.err (!%p328_p6)
}
 0x120   :  { %s332_s10 = scalar_lea.hbm %s408_s2, 512 }
 0x121   :  { %p333_p7 = scmp.ne.s32.totalorder %s408_s2, %s332_s10  ;;  %p336_p8 = scmp.lt.u32.totalorder %s332_s10, %s408_s2 }
 0x123   :  { %p338_p9 = pnand %p336_p8, %p333_p7 }
 0x125   :  { %341 = shalt.err (!%p338_p9)
}
 0x126   :  { %s353_s15 = smov 128   ;;  %s354_s16 = smov 8  }
 0x127   :  { %212 = dma.vmem_to_hbm [thread:$0]  %s207_s6, 512, %s408_s2, [#allocation5], %s353_s15, %s353_s15, %s354_s16  }
 0x128   :  { %346 = dma.done.wait [#allocation5], 512  }
 0x129   :  { %347 = vsyncadd [#allocation5], 4294966784 }
 0x12a   :  { %216 = vsyncpa [#allocation4], 1 }
 0x12b   :  { %217 = vsyncpa [#allocation7], 1 }
 0x12c   :  { %218 = vsyncpa [#allocation5], 1 }

</bundles_post_ra>
